<compile_context>
chip_gen: v5e
topology: v5e:2x2
jax: 0.10.0
libtpu: 0.0.40
codegen_flags: <defaults>
</compile_context>

<pallas_src>
import numpy as np
import jax
import jax.numpy as jnp
from jax.experimental import pallas as pl

# (kernel_size, stride, padding) matching SConv1 / SConv3 / SConv5 / SConv7
_CONV_SPECS = {1: (1, 1, 0), 3: (3, 1, 1), 5: (5, 2, 2), 7: (7, 2, 3)}

_BN_EPS = 1e-5
_V_TH = 1.0


# ----------------------------------------------------------------------------
# Fused Pallas kernel
# ----------------------------------------------------------------------------
def _make_fused_kernel(n_layers, K, pad, W, thresh):
    """Build the fused conv-stack + head kernel.

    Ref layout (all f32, whole arrays resident in VMEM, single invocation):
      refs[0]                  patches0 (K0*K0*Cin, M)    im2col of the input
      refs[1 + 2*i]            w_i      (Cout, K*K*Cprev) BN-scale-folded weights
      refs[2 + 2*i]            b_i      (Cout, 1)          folded BN bias
      refs[1+2*n_layers + 0]   masks    (K*K, M)           tap validity (0/1)
      refs[1+2*n_layers + 1]   pmat     (M, 4*N)           avg-pool matrix
      refs[1+2*n_layers + 2]   wl       (ncls, 4*Cout)     reordered linear weight
      refs[1+2*n_layers + 3]   bl       (ncls, 1)          linear bias
      refs[-1]                 o        (ncls, N)          logits (transposed)

    M = N*H*W with lane index m = n*H*W + i*W + j (channels on sublanes,
    flattened batch*spatial on lanes -> fully lane-dense vregs / stores).
    """

    def kernel(*refs):
        p0_ref = refs[0]
        masks_ref, pool_ref, wl_ref, bl_ref = refs[1 + 2 * n_layers:-1]
        o_ref = refs[-1]

        M = p0_ref.shape[1]
        x = p0_ref[...]                                     # (K0*K0*Cin, M)
        for li in range(n_layers):
            w_ref = refs[1 + 2 * li]
            b_ref = refs[2 + 2 * li]
            if li > 0:
                # In-kernel im2col: for each tap, shift the flattened spike map
                # along the lane axis (static slice + concat, no wrap ambiguity)
                # and zero the positions whose conv input would be padding.
                cols = []
                t = 0
                for kh in range(K):
                    for kw in range(K):
                        d = (kh - pad) * W + (kw - pad)     # flat spatial offset
                        dd = d % M
                        if dd == 0:
                            shifted = x
                        else:
                            shifted = jnp.concatenate(
                                [x[:, dd:], x[:, :dd]], axis=1)
                        cols.append(shifted * masks_ref[pl.ds(t, 1), :])
                        t += 1
                x = jnp.concatenate(cols, axis=0)           # (K*K*Cprev, M)
            # Conv (+ folded BN scale) as one MXU matmul, then BN bias + LIF
            # spike (T == 1 static path: Heaviside(y - V_th)).
            y = jnp.dot(w_ref[...], x, preferred_element_type=jnp.float32)
            x = (y + b_ref[...] >= thresh).astype(jnp.float32)   # (Cout, M)

        # Head: AdaptiveAvgPool2d((2,2)) as a single matmul against the pool
        # matrix (columns ordered q*N + n), regroup quadrants onto sublanes,
        # then Linear as a single matmul producing (ncls, N).
        pooled = jnp.dot(x, pool_ref[...],
                         preferred_element_type=jnp.float32)     # (Cout, 4*N)
        n_img = pool_ref.shape[1] // 4
        feats = jnp.concatenate(
            [pooled[:, q * n_img:(q + 1) * n_img] for q in range(4)],
            axis=0)                                              # (4*Cout, N)
        o_ref[...] = (jnp.dot(wl_ref[...], feats,
                              preferred_element_type=jnp.float32)
                      + bl_ref[...])

    return kernel


# ----------------------------------------------------------------------------
# Wrapper glue: layout conversion, im2col, BN folding, constant matrices
# ----------------------------------------------------------------------------
def _im2col_lane_major(x_nchw, K, P):
    """NCHW input -> (K*K*C, N*H*W) im2col slab, lane index m = n*H*W + i*W + j."""
    N, C, H, W = x_nchw.shape
    xp = jnp.pad(x_nchw, ((0, 0), (0, 0), (P, P), (P, P)))
    cols = []
    for kh in range(K):
        for kw in range(K):
            sl = xp[:, :, kh:kh + H, kw:kw + W]               # (N, C, H, W)
            cols.append(jnp.transpose(sl, (1, 0, 2, 3)).reshape(C, N * H * W))
    return jnp.concatenate(cols, axis=0)


def _fold_bn_into_weight(p):
    """Return (scale-folded (Cout, K*K*Cin) weight, (Cout,1) bias)."""
    scale = p["gamma"] / jnp.sqrt(p["var"] + _BN_EPS)
    bias = p["beta"] - p["mean"] * scale
    cout = p["w"].shape[0]
    # OIHW -> (Cout, K*K*Cin), column index t*Cin + ci with t = kh*K + kw.
    w2d = jnp.transpose(p["w"], (0, 2, 3, 1)).reshape(cout, -1)
    return w2d * scale[:, None], bias[:, None]


def _build_tap_masks(N, H, W, K, pad):
    """(K*K, N*H*W) 0/1 masks: 1 where the conv input for that tap is in-bounds."""
    i = np.arange(H * W) // W
    j = np.arange(H * W) % W
    rows = []
    for kh in range(K):
        for kw in range(K):
            dh, dw = kh - pad, kw - pad
            ok = ((i + dh >= 0) & (i + dh < H) & (j + dw >= 0) & (j + dw < W))
            rows.append(np.tile(ok.astype(np.float32), N))
    return jnp.asarray(np.stack(rows))


def _build_pool_matrix(N, H, W):
    """(N*H*W, 4*N) matrix implementing AdaptiveAvgPool2d((2,2)); col = q*N + n."""
    ph, pw = H // 2, W // 2
    M = N * H * W
    n = np.arange(M) // (H * W)
    rem = np.arange(M) % (H * W)
    q = ((rem // W) // ph) * 2 + (rem % W) // pw
    P = np.zeros((M, 4 * N), np.float32)
    P[np.arange(M), q * N + n] = 1.0 / (ph * pw)
    return jnp.asarray(P)


def spike_surrogate_block_forward(x_nchw, conv_params, w_lin, b_lin, T=1):
    if T != 1:
        # TODO(synk): T>1 temporal LIF membrane dynamics not implemented
        # (LIFSpike source not provided); refusing instead of silently
        # averaging over the wrong axis.
        raise NotImplementedError("Only the T == 1 static-input path is implemented.")

    N, Cin, H, W = x_nchw.shape
    ncls = w_lin.shape[0]
    cout = conv_params[0]["w"].shape[0]
    assert w_lin.shape[1] == 4 * cout

    K0, S0, P0 = _CONV_SPECS[conv_params[0]["k"]]
    assert S0 == 1, "TODO(synk): stride-2 first conv (SConv5/SConv7) not supported"
    for p in conv_params[1:]:
        Ki, Si, _ = _CONV_SPECS[p["k"]]
        assert (Ki, Si) == (3, 1), \
            "TODO(synk): fused kernel supports only 3x3 / stride-1 inner convs"

    # Host/XLA-side prep (cheap glue): layer-0 im2col, BN folding, constants.
    patches0 = _im2col_lane_major(x_nchw, K0, P0)             # (K0*K0*Cin, M)
    wbs = []
    for p in conv_params:
        w2d, b = _fold_bn_into_weight(p)
        wbs += [w2d, b]
    masks = _build_tap_masks(N, H, W, 3, 1)                    # (9, M)
    pmat = _build_pool_matrix(N, H, W)                         # (M, 4*N)
    # PyTorch Flatten of (N, C, 2, 2) -> feature c*4 + q; kernel uses q*C + c.
    wlr = jnp.transpose(w_lin.reshape(ncls, cout, 4), (0, 2, 1)).reshape(ncls, 4 * cout)
    blr = b_lin[:, None]

    kern = _make_fused_kernel(n_layers=len(conv_params), K=3, pad=1, W=W,
                              thresh=_V_TH)
    # Single fused invocation: no grid, whole (KB-scale) operands live in VMEM.
    # (On v7x a "parallel" batch grid axis could feed the second TensorCore; at
    #  this size removing launches/steps is the bigger win, so keep one step.)
    logits_t = pl.pallas_call(
        kern,
        out_shape=jax.ShapeDtypeStruct((ncls, N), jnp.float32),
    )(patches0, *wbs, masks, pmat, wlr, blr)
    return logits_t.T                                          # (N, ncls)


# ----------------------------------------------------------------------------
# Parameter construction (deterministic, synthetic) + pure-JAX reference
# ----------------------------------------------------------------------------
def build_params(key, kernels, in_channel, out_channel, num_classes):
    # Mirror SpikeSurrogateBlock.__init__ layer construction.
    layer_specs = []
    if in_channel > out_channel:
        layer_specs.append((1, in_channel, out_channel))
        for k in kernels:
            layer_specs.append((k, out_channel, out_channel))
    else:
        layer_specs.append((kernels[0], in_channel, out_channel))
        for k in kernels[1:]:
            layer_specs.append((k, out_channel, out_channel))

    conv_params = []
    for (k, cin, cout) in layer_specs:
        key, k1, k2, k3, k4, k5 = jax.random.split(key, 6)
        fan_in = cin * k * k
        conv_params.append(dict(
            k=k,
            w=jax.random.normal(k1, (cout, cin, k, k), jnp.float32)
              * (2.0 / fan_in) ** 0.5,
            gamma=1.0 + 0.3 * jax.random.normal(k2, (cout,), jnp.float32),
            beta=0.3 * jax.random.normal(k3, (cout,), jnp.float32),
            mean=0.1 * jax.random.normal(k4, (cout,), jnp.float32),
            var=jnp.abs(1.0 + 0.3 * jax.random.normal(k5, (cout,), jnp.float32))
                + 0.1,
        ))
    key, kw, kb = jax.random.split(key, 3)
    w_lin = jax.random.normal(kw, (num_classes, out_channel * 4), jnp.float32) \
            * (1.0 / (out_channel * 4)) ** 0.5
    b_lin = 0.1 * jax.random.normal(kb, (num_classes,), jnp.float32)
    return conv_params, w_lin, b_lin


def reference_forward(x_nchw, conv_params, w_lin, b_lin):
    x = x_nchw
    for p in conv_params:
        K, S, P = _CONV_SPECS[p["k"]]
        y = jax.lax.conv_general_dilated(
            x, p["w"], (S, S), [(P, P), (P, P)],
            dimension_numbers=("NCHW", "OIHW", "NCHW"))
        scale = p["gamma"] / jnp.sqrt(p["var"] + _BN_EPS)
        bias = p["beta"] - p["mean"] * scale
        y = y * scale[None, :, None, None] + bias[None, :, None, None]
        x = (y >= _V_TH).astype(jnp.float32)
    N, C, H, W = x.shape
    pooled = x.reshape(N, C, 2, H // 2, 2, W // 2).mean(axis=(3, 5))  # (N,C,2,2)
    flat = pooled.reshape(N, C * 4)
    return flat @ w_lin.T + b_lin


# ----------------------------------------------------------------------------
if __name__ == "__main__":
    kernels = [3, 3]
    in_channel, out_channel, num_classes = 4, 8, 10
    N, H, W = 2, 16, 16
    T = 1

    key = jax.random.PRNGKey(0)
    key, kx = jax.random.split(key)
    x = jax.random.normal(kx, (N, in_channel, H, W), jnp.float32)  # NCHW input

    conv_params, w_lin, b_lin = build_params(
        key, kernels, in_channel, out_channel, num_classes)

    out = spike_surrogate_block_forward(x, conv_params, w_lin, b_lin, T=T)
    out = jax.block_until_ready(out)

    ref = reference_forward(x, conv_params, w_lin, b_lin)
    np.testing.assert_allclose(np.asarray(out), np.asarray(ref),
                               rtol=2e-4, atol=2e-4)
    print("KERNEL_OK")
</pallas_src>

<mosaic_0001>
module attributes {stable_mosaic.version = 11 : i64} {
  func.func @kernel(%arg0: memref<36x512xf32, #tpu.memory_space<vmem>>, %arg1: memref<8x36xf32, #tpu.memory_space<vmem>>, %arg2: memref<8x1xf32, #tpu.memory_space<vmem>>, %arg3: memref<8x72xf32, #tpu.memory_space<vmem>>, %arg4: memref<8x1xf32, #tpu.memory_space<vmem>>, %arg5: memref<9x512xf32, #tpu.memory_space<vmem>>, %arg6: memref<512x8xf32, #tpu.memory_space<vmem>>, %arg7: memref<10x32xf32, #tpu.memory_space<vmem>>, %arg8: memref<10x1xf32, #tpu.memory_space<vmem>>, %arg9: memref<10x2xf32, #tpu.memory_space<vmem>>) attributes {dimension_semantics = [], scalar_prefetch = 0 : i64, scratch_operands = 0 : i64, tpu.core_type = #tpu.core_type<tc>} {
    %c0 = arith.constant 0 : index
    %c0_0 = arith.constant 0 : index
    %0 = vector.load %arg0[%c0, %c0_0] : memref<36x512xf32, #tpu.memory_space<vmem>>, vector<36x512xf32>
    %c0_1 = arith.constant 0 : index
    %c0_2 = arith.constant 0 : index
    %1 = vector.load %arg1[%c0_1, %c0_2] : memref<8x36xf32, #tpu.memory_space<vmem>>, vector<8x36xf32>
    %cst = arith.constant dense<0.000000e+00> : vector<8x512xf32>
    %2 = tpu.matmul %1, %0, %cst {dimension_numbers = #tpu.dot_dimension_numbers<[1], [0], [0], [1], [0, 0, 1, 1], [], []>} : vector<8x36xf32>, vector<36x512xf32>, vector<8x512xf32> -> vector<8x512xf32>
    %c0_3 = arith.constant 0 : index
    %c0_4 = arith.constant 0 : index
    %3 = vector.load %arg2[%c0_3, %c0_4] : memref<8x1xf32, #tpu.memory_space<vmem>>, vector<8x1xf32>
    %4 = vector.broadcast %3 : vector<8x1xf32> to vector<8x512xf32>
    %5 = arith.addf %2, %4 : vector<8x512xf32>
    %cst_5 = arith.constant 1.000000e+00 : f32
    %6 = vector.broadcast %cst_5 : f32 to vector<8x512xf32>
    %7 = arith.cmpf oge, %5, %6 : vector<8x512xf32>
    %8 = arith.extui %7 : vector<8x512xi1> to vector<8x512xi32>
    %9 = arith.sitofp %8 : vector<8x512xi32> to vector<8x512xf32>
    %10 = vector.extract_strided_slice %9 {offsets = [0, 495], sizes = [8, 17], strides = [1, 1]} : vector<8x512xf32> to vector<8x17xf32>
    %11 = vector.extract_strided_slice %9 {offsets = [0, 0], sizes = [8, 495], strides = [1, 1]} : vector<8x512xf32> to vector<8x495xf32>
    %12 = tpu.concatenate %10, %11 in 1 : vector<8x17xf32>, vector<8x495xf32> -> vector<8x512xf32>
    %c0_6 = arith.constant 0 : index
    %c0_7 = arith.constant 0 : index
    %13 = vector.load %arg5[%c0_6, %c0_7] : memref<9x512xf32, #tpu.memory_space<vmem>>, vector<1x512xf32>
    %14 = vector.broadcast %13 : vector<1x512xf32> to vector<8x512xf32>
    %15 = arith.mulf %12, %14 : vector<8x512xf32>
    %16 = vector.extract_strided_slice %9 {offsets = [0, 496], sizes = [8, 16], strides = [1, 1]} : vector<8x512xf32> to vector<8x16xf32>
    %17 = vector.extract_strided_slice %9 {offsets = [0, 0], sizes = [8, 496], strides = [1, 1]} : vector<8x512xf32> to vector<8x496xf32>
    %18 = tpu.concatenate %16, %17 in 1 : vector<8x16xf32>, vector<8x496xf32> -> vector<8x512xf32>
    %c1 = arith.constant 1 : index
    %c0_8 = arith.constant 0 : index
    %19 = vector.load %arg5[%c1, %c0_8] : memref<9x512xf32, #tpu.memory_space<vmem>>, vector<1x512xf32>
    %20 = vector.broadcast %19 : vector<1x512xf32> to vector<8x512xf32>
    %21 = arith.mulf %18, %20 : vector<8x512xf32>
    %22 = vector.extract_strided_slice %9 {offsets = [0, 497], sizes = [8, 15], strides = [1, 1]} : vector<8x512xf32> to vector<8x15xf32>
    %23 = vector.extract_strided_slice %9 {offsets = [0, 0], sizes = [8, 497], strides = [1, 1]} : vector<8x512xf32> to vector<8x497xf32>
    %24 = tpu.concatenate %22, %23 in 1 : vector<8x15xf32>, vector<8x497xf32> -> vector<8x512xf32>
    %c2 = arith.constant 2 : index
    %c0_9 = arith.constant 0 : index
    %25 = vector.load %arg5[%c2, %c0_9] : memref<9x512xf32, #tpu.memory_space<vmem>>, vector<1x512xf32>
    %26 = vector.broadcast %25 : vector<1x512xf32> to vector<8x512xf32>
    %27 = arith.mulf %24, %26 : vector<8x512xf32>
    %28 = vector.extract_strided_slice %9 {offsets = [0, 511], sizes = [8, 1], strides = [1, 1]} : vector<8x512xf32> to vector<8x1xf32>
    %29 = vector.extract_strided_slice %9 {offsets = [0, 0], sizes = [8, 511], strides = [1, 1]} : vector<8x512xf32> to vector<8x511xf32>
    %30 = tpu.concatenate %28, %29 in 1 : vector<8x1xf32>, vector<8x511xf32> -> vector<8x512xf32>
    %c3 = arith.constant 3 : index
    %c0_10 = arith.constant 0 : index
    %31 = vector.load %arg5[%c3, %c0_10] : memref<9x512xf32, #tpu.memory_space<vmem>>, vector<1x512xf32>
    %32 = vector.broadcast %31 : vector<1x512xf32> to vector<8x512xf32>
    %33 = arith.mulf %30, %32 : vector<8x512xf32>
    %c4 = arith.constant 4 : index
    %c0_11 = arith.constant 0 : index
    %34 = vector.load %arg5[%c4, %c0_11] : memref<9x512xf32, #tpu.memory_space<vmem>>, vector<1x512xf32>
    %35 = vector.broadcast %34 : vector<1x512xf32> to vector<8x512xf32>
    %36 = arith.mulf %9, %35 : vector<8x512xf32>
    %37 = vector.extract_strided_slice %9 {offsets = [0, 1], sizes = [8, 511], strides = [1, 1]} : vector<8x512xf32> to vector<8x511xf32>
    %38 = vector.extract_strided_slice %9 {offsets = [0, 0], sizes = [8, 1], strides = [1, 1]} : vector<8x512xf32> to vector<8x1xf32>
    %39 = tpu.concatenate %37, %38 in 1 : vector<8x511xf32>, vector<8x1xf32> -> vector<8x512xf32>
    %c5 = arith.constant 5 : index
    %c0_12 = arith.constant 0 : index
    %40 = vector.load %arg5[%c5, %c0_12] : memref<9x512xf32, #tpu.memory_space<vmem>>, vector<1x512xf32>
    %41 = vector.broadcast %40 : vector<1x512xf32> to vector<8x512xf32>
    %42 = arith.mulf %39, %41 : vector<8x512xf32>
    %43 = vector.extract_strided_slice %9 {offsets = [0, 15], sizes = [8, 497], strides = [1, 1]} : vector<8x512xf32> to vector<8x497xf32>
    %44 = vector.extract_strided_slice %9 {offsets = [0, 0], sizes = [8, 15], strides = [1, 1]} : vector<8x512xf32> to vector<8x15xf32>
    %45 = tpu.concatenate %43, %44 in 1 : vector<8x497xf32>, vector<8x15xf32> -> vector<8x512xf32>
    %c6 = arith.constant 6 : index
    %c0_13 = arith.constant 0 : index
    %46 = vector.load %arg5[%c6, %c0_13] : memref<9x512xf32, #tpu.memory_space<vmem>>, vector<1x512xf32>
    %47 = vector.broadcast %46 : vector<1x512xf32> to vector<8x512xf32>
    %48 = arith.mulf %45, %47 : vector<8x512xf32>
    %49 = vector.extract_strided_slice %9 {offsets = [0, 16], sizes = [8, 496], strides = [1, 1]} : vector<8x512xf32> to vector<8x496xf32>
    %50 = vector.extract_strided_slice %9 {offsets = [0, 0], sizes = [8, 16], strides = [1, 1]} : vector<8x512xf32> to vector<8x16xf32>
    %51 = tpu.concatenate %49, %50 in 1 : vector<8x496xf32>, vector<8x16xf32> -> vector<8x512xf32>
    %c7 = arith.constant 7 : index
    %c0_14 = arith.constant 0 : index
    %52 = vector.load %arg5[%c7, %c0_14] : memref<9x512xf32, #tpu.memory_space<vmem>>, vector<1x512xf32>
    %53 = vector.broadcast %52 : vector<1x512xf32> to vector<8x512xf32>
    %54 = arith.mulf %51, %53 : vector<8x512xf32>
    %55 = vector.extract_strided_slice %9 {offsets = [0, 17], sizes = [8, 495], strides = [1, 1]} : vector<8x512xf32> to vector<8x495xf32>
    %56 = vector.extract_strided_slice %9 {offsets = [0, 0], sizes = [8, 17], strides = [1, 1]} : vector<8x512xf32> to vector<8x17xf32>
    %57 = tpu.concatenate %55, %56 in 1 : vector<8x495xf32>, vector<8x17xf32> -> vector<8x512xf32>
    %c8 = arith.constant 8 : index
    %c0_15 = arith.constant 0 : index
    %58 = vector.load %arg5[%c8, %c0_15] : memref<9x512xf32, #tpu.memory_space<vmem>>, vector<1x512xf32>
    %59 = vector.broadcast %58 : vector<1x512xf32> to vector<8x512xf32>
    %60 = arith.mulf %57, %59 : vector<8x512xf32>
    %61 = tpu.concatenate %15, %21, %27, %33, %36, %42, %48, %54, %60 in 0 : vector<8x512xf32>, vector<8x512xf32>, vector<8x512xf32>, vector<8x512xf32>, vector<8x512xf32>, vector<8x512xf32>, vector<8x512xf32>, vector<8x512xf32>, vector<8x512xf32> -> vector<72x512xf32>
    %c0_16 = arith.constant 0 : index
    %c0_17 = arith.constant 0 : index
    %62 = vector.load %arg3[%c0_16, %c0_17] : memref<8x72xf32, #tpu.memory_space<vmem>>, vector<8x72xf32>
    %cst_18 = arith.constant dense<0.000000e+00> : vector<8x512xf32>
    %63 = tpu.matmul %62, %61, %cst_18 {dimension_numbers = #tpu.dot_dimension_numbers<[1], [0], [0], [1], [0, 0, 1, 1], [], []>} : vector<8x72xf32>, vector<72x512xf32>, vector<8x512xf32> -> vector<8x512xf32>
    %c0_19 = arith.constant 0 : index
    %c0_20 = arith.constant 0 : index
    %64 = vector.load %arg4[%c0_19, %c0_20] : memref<8x1xf32, #tpu.memory_space<vmem>>, vector<8x1xf32>
    %65 = vector.broadcast %64 : vector<8x1xf32> to vector<8x512xf32>
    %66 = arith.addf %63, %65 : vector<8x512xf32>
    %cst_21 = arith.constant 1.000000e+00 : f32
    %67 = vector.broadcast %cst_21 : f32 to vector<8x512xf32>
    %68 = arith.cmpf oge, %66, %67 : vector<8x512xf32>
    %69 = arith.extui %68 : vector<8x512xi1> to vector<8x512xi32>
    %70 = arith.sitofp %69 : vector<8x512xi32> to vector<8x512xf32>
    %c0_22 = arith.constant 0 : index
    %c0_23 = arith.constant 0 : index
    %71 = vector.load %arg6[%c0_22, %c0_23] : memref<512x8xf32, #tpu.memory_space<vmem>>, vector<512x8xf32>
    %cst_24 = arith.constant dense<0.000000e+00> : vector<8x8xf32>
    %72 = tpu.matmul %70, %71, %cst_24 {dimension_numbers = #tpu.dot_dimension_numbers<[1], [0], [0], [1], [0, 0, 1, 1], [], []>} : vector<8x512xf32>, vector<512x8xf32>, vector<8x8xf32> -> vector<8x8xf32>
    %73 = vector.extract_strided_slice %72 {offsets = [0, 0], sizes = [8, 2], strides = [1, 1]} : vector<8x8xf32> to vector<8x2xf32>
    %74 = vector.extract_strided_slice %72 {offsets = [0, 2], sizes = [8, 2], strides = [1, 1]} : vector<8x8xf32> to vector<8x2xf32>
    %75 = vector.extract_strided_slice %72 {offsets = [0, 4], sizes = [8, 2], strides = [1, 1]} : vector<8x8xf32> to vector<8x2xf32>
    %76 = vector.extract_strided_slice %72 {offsets = [0, 6], sizes = [8, 2], strides = [1, 1]} : vector<8x8xf32> to vector<8x2xf32>
    %77 = tpu.concatenate %73, %74, %75, %76 in 0 : vector<8x2xf32>, vector<8x2xf32>, vector<8x2xf32>, vector<8x2xf32> -> vector<32x2xf32>
    %c0_25 = arith.constant 0 : index
    %c0_26 = arith.constant 0 : index
    %78 = vector.load %arg7[%c0_25, %c0_26] : memref<10x32xf32, #tpu.memory_space<vmem>>, vector<10x32xf32>
    %cst_27 = arith.constant dense<0.000000e+00> : vector<10x2xf32>
    %79 = tpu.matmul %78, %77, %cst_27 {dimension_numbers = #tpu.dot_dimension_numbers<[1], [0], [0], [1], [0, 0, 1, 1], [], []>} : vector<10x32xf32>, vector<32x2xf32>, vector<10x2xf32> -> vector<10x2xf32>
    %c0_28 = arith.constant 0 : index
    %c0_29 = arith.constant 0 : index
    %80 = vector.load %arg8[%c0_28, %c0_29] : memref<10x1xf32, #tpu.memory_space<vmem>>, vector<10x1xf32>
    %81 = vector.broadcast %80 : vector<10x1xf32> to vector<10x2xf32>
    %82 = arith.addf %79, %81 : vector<10x2xf32>
    %c0_30 = arith.constant 0 : index
    %c0_31 = arith.constant 0 : index
    %83 = vector.load %arg9[%c0_30, %c0_31] : memref<10x2xf32, #tpu.memory_space<vmem>>, vector<10x2xf32>
    tpu.vector_store %arg9[%c0_30, %c0_31], %82 {strides = array<i32>} : memref<10x2xf32, #tpu.memory_space<vmem>>, vector<10x2xf32>,
    return
  }
}

</mosaic_0001>

<bundles_post_ra>
// kernel: tpu_custom_call.1
= control target key start
LH: loop header
LB: loop body
LE: loop exit
PB: predicated region body
PF: predicated region fallthrough
CT: control target
= control target key end

     0   :  { %vm63_vm0 = vcmask 1043456   ;;  %v869_v3 = vmov 0   ;;  %vm59_vm1 = vcmask 293888   ;;  %v870_v28 = vmov 0.0   ;;  %s874_s11 = smov 113   ;;  %s875_s12 = smov 1   ;;  %s1420_s0 = inlined_call_operand.vmem [shape: f32[36,512], index: 0, kind: input, shape index: {}]   ;;  %s1421_s1 = inlined_call_operand.vmem [shape: f32[8,36], index: 1, kind: input, shape index: {}]   ;;  %s1422_s2 = inlined_call_operand.vmem [shape: f32[8,1], index: 2, kind: input, shape index: {}]   ;;  %s1423_s5 = inlined_call_operand.vmem [shape: f32[9,512], index: 5, kind: input, shape index: {}]   ;;  %s1424_s4 = inlined_call_operand.vmem [shape: f32[8,1], index: 4, kind: input, shape index: {}]   ;;  %s1425_s3 = inlined_call_operand.vmem [shape: f32[8,72], index: 3, kind: input, shape index: {}]   ;;  %s1426_s6 = inlined_call_operand.vmem [shape: f32[512,8], index: 6, kind: input, shape index: {}]   ;;  %s1427_s8 = inlined_call_operand.vmem [shape: f32[10,1], index: 8, kind: input, shape index: {}]   ;;  %s1428_s7 = inlined_call_operand.vmem [shape: f32[10,32], index: 7, kind: input, shape index: {}]   ;;  %s1429_s9 = inlined_call_operand.vmem [shape: f32[10,2], index: 9, kind: output, shape index: {}]  }
   0x1   :  { %v48_v0 = vld [vmem:[%s1420_s0 + $0x80] sm:$0xf]  ;;  %v49_v1 = vld [vmem:[%s1420_s0 + $0x88] sm:$0xf]  ;;  %v50_v2 = vld [vmem:[%s1420_s0 + $0x90] sm:$0xf]  ;;  %811 = vset.pattern.permute.xlu0 %v869_v3  ;;  %867 = vset.pattern.permute.xlu1 %v869_v3 }
   0x2   :  { %759 = vmatpush.msk.msra.mxu0 %vm63_vm0, %v48_v0  ;;  %761 = vmatpush.msk.msra.mxu1 %vm63_vm0, %v49_v1  ;;  %v51_v4 = vld [vmem:[%s1420_s0 + $0x98] sm:$0xf]  ;;  %v44_v5 = vld [vmem:[%s1420_s0 + $0x60] sm:$0xff]  ;;  %v45_v6 = vld [vmem:[%s1420_s0 + $0x68] sm:$0xff]  ;;  %s876_s13 = smov 16   ;;  %s877_s14 = smov 17  }
   0x3   :  { %763 = vmatpush.msk.msra.mxu2 %vm63_vm0, %v50_v2  ;;  %765 = vmatpush.msk.msra.mxu3 %vm63_vm0, %v51_v4  ;;  %v46_v7 = vld [vmem:[%s1420_s0 + $0x70] sm:$0xff]  ;;  %v47_v8 = vld [vmem:[%s1420_s0 + $0x78] sm:$0xff]  ;;  %v40_v9 = vld [vmem:[%s1420_s0 + $0x40] sm:$0xff]  ;;  %s878_s15 = smov 15   ;;  %vm425_vm6 = vcmask 908288   ;;  %vm392_vm7 = vcmask 916480  }
   0x4   :  { %88 = vmatpush.msra.mxu0 %v44_v5  ;;  %108 = vmatpush.msra.mxu1 %v45_v6  ;;  %v41_v10 = vld [vmem:[%s1420_s0 + $0x48] sm:$0xff]  ;;  %v42_v11 = vld [vmem:[%s1420_s0 + $0x50] sm:$0xff]  ;;  %v43_v12 = vld [vmem:[%s1420_s0 + $0x58] sm:$0xff]  ;;  %vm359_vm8 = vcmask 924672   ;;  %vm326_vm9 = vcmask 1039360   ;;  %vm279_vm10 = vcmask 7168  }
   0x5   :  { %128 = vmatpush.msra.mxu2 %v46_v7  ;;  %148 = vmatpush.msra.mxu3 %v47_v8  ;;  %v36_v13 = vld [vmem:[%s1420_s0 + $0x20] sm:$0xff]  ;;  %v37_v14 = vld [vmem:[%s1420_s0 + $0x28] sm:$0xff]  ;;  %v38_v15 = vld [vmem:[%s1420_s0 + $0x30] sm:$0xff]  ;;  %vm246_vm11 = vcmask 121856   ;;  %vm213_vm12 = vcmask 130048   ;;  %vm181_vm13 = vcmask 138240  }
   0x6   :  { %89 = vmatpush.msra.mxu0 %v40_v9  ;;  %109 = vmatpush.msra.mxu1 %v41_v10  ;;  %v39_v16 = vld [vmem:[%s1420_s0 + $0x38] sm:$0xff]  ;;  %v32_v17 = vld [vmem:[%s1420_s0] sm:$0xff]  ;;  %v33_v18 = vld [vmem:[%s1420_s0 + $0x8] sm:$0xff]  ;;  %vm457_vm14 = vcmask 588800   ;;  %s881_s30 = smov 124   ;;  %s882_s10 = smov 122  }
   0x7   :  { %129 = vmatpush.msra.mxu2 %v42_v11  ;;  %149 = vmatpush.msra.mxu3 %v43_v12  ;;  %v34_v19 = vld [vmem:[%s1420_s0 + $0x10] sm:$0xff]  ;;  %v35_v20 = vld [vmem:[%s1420_s0 + $0x18] sm:$0xff]  ;;  %v52_v21 = vld [vmem:[%s1421_s1] sm:$0xff]  ;;  %s871_s0 = smov 112   ;;  %s872_s1 = smov 111  }
   0x8   :  { %90 = vmatpush.msra.mxu0 %v36_v13  ;;  %110 = vmatpush.msra.mxu1 %v37_v14  ;;  %v53_v22 = vld [vmem:[%s1422_s2] sm:$0xff]  ;;  %s873_s2 = smov 127  }
   0x9   :  { %130 = vmatpush.msra.mxu2 %v38_v15  ;;  %150 = vmatpush.msra.mxu3 %v39_v16  ;;  %v778_v42 = vld [vmem:[%s1423_s5 + $0x20] ss:$8 sm:$0xf]  ;;  %v1035_v45 = vld [vmem:[%s1423_s5 + $0x7] ss:$8 sm:$0xf] }
   0xa   :  { %91 = vmatpush.msra.mxu0 %v32_v17  ;;  %111 = vmatpush.msra.mxu1 %v33_v18  ;;  %v438_v47 = vperm.slane %v778_v42, 0  ;;  %v405_v50 = vperm.slane %v1035_v45, 0  ;;  %v439_v57 = vperm.slane %v778_v42, 1  ;;  %v440_v58 = vperm.slane %v778_v42, 2 }
   0xb   :  { %131 = vmatpush.msra.mxu2 %v34_v19  ;;  %151 = vmatpush.msra.mxu3 %v35_v20  ;;  %v441_v59 = vperm.slane %v778_v42, 3  ;;  %v1049_v60 = vld [vmem:[%s1423_s5 + $0x6] ss:$8 sm:$0xf] }
   0xc   :  { %760 = vmatmul.msk.f32.vlgmr.msra.gmra.mxu0 %vm59_vm1, %v52_v21  ;;  %762 = vmatmul.msk.f32.vlgmr.msra.gmra.mxu1 %vm59_vm1, %v52_v21  ;;  %v372_v0 = vperm.slane %v1049_v60, 0  ;;  %v1059_v10 = vld [vmem:[%s1423_s5 + $0x5] ss:$8 sm:$0xf] }
   0xd   :  { %764 = vmatmul.msk.f32.vlgmr.msra.gmra.mxu2 %vm59_vm1, %v52_v21  ;;  %766 = vmatmul.msk.f32.vlgmr.msra.gmra.mxu3 %vm59_vm1, %v52_v21  ;;  %v1064_v12 = vld [vmem:[%s1423_s5 + $0x4] ss:$8 sm:$0xf]  ;;  %v339_v13 = vperm.slane %v1059_v10, 0 }
   0xe   :  { %56 = vperm.xlu0 %811, %v53_v22   ;;  %868 = vset.pattern.permute.xlu2 %v869_v3  ;;  %v306_v16 = vperm.slane %v1064_v12, 0 }
  0x80   :  { %v57_v23 = vpop.permute.xlu0 %56 }
  0x89   :  { %v93_v24 = vpop.f32.mrf.mxu0  ;;  %v113_v25 = vpop.f32.mrf.mxu1 }
  0x8a   :  { %v94_v26 = vadd.f32 %v93_v24, %v57_v23  ;;  %v114_v27 = vadd.f32 %v113_v25, %v57_v23  ;;  %v307_v24 = vperm.slane %v1064_v12, 1 }
  0x8c   :  { %vm156_vm2 = vcmp.ge.f32.partialorder %v94_v26, 1.0  ;;  %vm157_vm3 = vcmp.ge.f32.partialorder %v114_v27, 1.0  ;;  %v373_v26 = vperm.slane %v1049_v60, 1  ;;  %v374_v27 = vperm.slane %v1049_v60, 2 }
  0x8d   :  { %v999_v29 = vsel %vm156_vm2, 1.0, %v870_v28  ;;  %v1001_v30 = vsel %vm157_vm3, 1.0, %v870_v28  ;;  %vm721_vm3 = vcmask 261120  }
  0x8e   :  { %v817_v31 = vpack.i.bf16 %v1001_v30, %v999_v29  ;;  %v314_v20 = vmul.f32 %v999_v29, %v306_v16 }
  0x90   :  { %v133_v32 = vpop.f32.mrf.mxu2  ;;  %v153_v33 = vpop.f32.mrf.mxu3  ;;  %818 = vrot.lane.b32.xlu2 %v817_v31, %s871_s0  ;;  %813 = vrot.lane.b32.xlu1 %v817_v31, %s872_s1 }
  0x91   :  { %v134_v34 = vadd.f32 %v133_v32, %v57_v23  ;;  %v154_v35 = vadd.f32 %v153_v33, %v57_v23  ;;  %v407_v33 = vperm.slane %v1035_v45, 2 }
  0x93   :  { %vm158_vm4 = vcmp.ge.f32.partialorder %v134_v34, 1.0  ;;  %vm159_vm5 = vcmp.ge.f32.partialorder %v154_v35, 1.0  ;;  %v408_v34 = vperm.slane %v1035_v45, 3  ;;  %v341_v35 = vperm.slane %v1059_v10, 2 }
  0x94   :  { %v1005_v36 = vsel %vm158_vm4, 1.0, %v870_v28  ;;  %v1007_v37 = vsel %vm159_vm5, 1.0, %v870_v28  ;;  %v375_v28 = vperm.slane %v1049_v60, 3  ;;  %vm753_vm4 = vcmask 9216  }
  0x95   :  { %v827_v38 = vpack.i.bf16 %v1007_v37, %v1005_v36  ;;  %v847_v39 = vpack.i.bf16 %v1005_v36, %v1001_v30  ;;  %vm751_vm5 = vcmask 15360  }
  0x97   :  { %828 = vrot.lane.b32.xlu0 %v827_v38, %s872_s1 }
  0x98   :  { %318 = vrot.lane.b32.xlu2 %v999_v29, %s873_s2  ;;  %823 = vrot.lane.b32.xlu1 %v817_v31, %s874_s11  ;;  %v340_v31 = vperm.slane %v1059_v10, 1 }
  0x9f   :  { %843 = vrot.lane.b32.xlu0 %v827_v38, %s873_s2 }
  0xa0   :  { %838 = vrot.lane.b32.xlu2 %v827_v38, %s874_s11  ;;  %320 = vrot.lane.b32.xlu1 %v1001_v30, %s873_s2 }
  0xa7   :  { %848 = vrot.lane.b32.xlu0 %v847_v39, %s875_s12 }
  0xa8   :  { %270 = vrot.lane.b32.xlu2 %v1007_v37, %s875_s12  ;;  %833 = vrot.lane.b32.xlu1 %v827_v38, %s871_s0 }
  0xaf   :  { %858 = vrot.lane.b32.xlu0 %v847_v39, %s876_s13 }
  0xb0   :  { %863 = vrot.lane.b32.xlu2 %v847_v39, %s877_s14  ;;  %853 = vrot.lane.b32.xlu1 %v847_v39, %s878_s15 }
  0xb7   :  { %204 = vrot.lane.b32.xlu0 %v1007_v37, %s876_s13 }
  0xb8   :  { %169 = vrot.lane.b32.xlu2 %v1007_v37, %s877_s14  ;;  %237 = vrot.lane.b32.xlu1 %v1007_v37, %s878_s15 }
  0xbf   :  { %273 = vrot.lane.b32.xlu0 %v999_v29, %s875_s12 }
  0xc0   :  { %207 = vrot.lane.b32.xlu2 %v999_v29, %s876_s13  ;;  %240 = vrot.lane.b32.xlu1 %v999_v29, %s878_s15 }
  0xc7   :  { %175 = vrot.lane.b32.xlu0 %v999_v29, %s877_s14  ;;  %v406_v29 = vperm.slane %v1035_v45, 1 }
  0xea   :  { %v1023_v40 = vpop.permute.xlu2 %818 }
  0xeb   :  { %v821_v43 = vunpack.i.h.bf16 %v1023_v40  ;;  %v820_v44 = vunpack.i.l.bf16 %v1023_v40 }
  0xed   :  { %v393_v52 = vsel %vm392_vm7, %v820_v44, %v821_v43 }
  0xee   :  { %v413_v54 = vmul.f32 %v405_v50, %v393_v52 }
  0xf2   :  { %v1025_v41 = vpop.permute.xlu2 %318 }
  0xfa   :  { %v1044_v55 = vpop.permute.xlu2 %838 }
  0xfb   :  { %v841_v21 = vunpack.i.h.bf16 %v1044_v55  ;;  %v840_v22 = vunpack.i.l.bf16 %v1044_v55 }
 0x102   :  { %v814_v46 = vpop.permute.xlu1 %813  ;;  %v1068_v17 = vpop.permute.xlu2 %270 }
 0x103   :  { %v816_v48 = vunpack.i.h.bf16 %v814_v46  ;;  %v815_v49 = vunpack.i.l.bf16 %v814_v46  ;;  %v342_v46 = vperm.slane %v1059_v10, 3 }
 0x105   :  { %v426_v51 = vsel %vm425_vm6, %v815_v49, %v816_v48 }
 0x106   :  { %v446_v53 = vmul.f32 %v438_v47, %v426_v51 }
 0x108   :  { %468 = vmatpush.msrb.mxu0 %v446_v53 }
 0x109   :  { %v829_v56 = vpop.permute.xlu0 %828 }
 0x10a   :  { %v831_v61 = vunpack.i.h.bf16 %v829_v56  ;;  %v830_v62 = vunpack.i.l.bf16 %v829_v56  ;;  %v824_v63 = vpop.permute.xlu1 %823  ;;  %469 = vmatpush.msrb.mxu0 %v413_v54  ;;  %v1091_v51 = vpop.permute.xlu2 %863 }
 0x10b   :  { %v826_v1 = vunpack.i.h.bf16 %v824_v63  ;;  %v825_v2 = vunpack.i.l.bf16 %v824_v63  ;;  %v315_v63 = vmul.f32 %v1001_v30, %v307_v24 }
 0x10c   :  { %v427_v3 = vsel %vm425_vm6, %v816_v48, %v830_v62  ;;  %v428_v4 = vsel %vm425_vm6, %v830_v62, %v831_v61  ;;  %v434_v5 = vsel %vm425_vm6, %v831_v61, %v815_v49  ;;  %v362_v49 = vsel %vm359_vm8, %v840_v22, %v841_v21 }
 0x10d   :  { %v447_v6 = vmul.f32 %v439_v57, %v427_v3  ;;  %v448_v7 = vmul.f32 %v440_v58, %v428_v4  ;;  %v449_v8 = vmul.f32 %v441_v59, %v434_v5  ;;  %v360_v9 = vsel %vm359_vm8, %v825_v2, %v826_v1  ;;  %v1105_v59 = vld [vmem:[%s1423_s5 + $0x3] ss:$8 sm:$0xf]  ;;  %v1123_v5 = vld [vmem:[%s1423_s5 + $0x2] ss:$8 sm:$0xf] }
 0x10e   :  { %v380_v11 = vmul.f32 %v372_v0, %v360_v9  ;;  %v361_v48 = vsel %vm359_vm8, %v826_v1, %v840_v22  ;;  %v368_v50 = vsel %vm359_vm8, %v841_v21, %v825_v2  ;;  %v382_v62 = vmul.f32 %v374_v27, %v362_v49 }
 0x10f   :  { %488 = vmatpush.msrb.mxu1 %v447_v6  ;;  %508 = vmatpush.msrb.mxu2 %v448_v7  ;;  %v381_v61 = vmul.f32 %v373_v26, %v361_v48  ;;  %v309_v0 = vperm.slane %v1064_v12, 3  ;;  %v383_v2 = vmul.f32 %v375_v28, %v368_v50  ;;  %v293_v4 = vperm.slane %v1105_v59, 2  ;;  %v1172_v48 = vld [vmem:[%s1425_s3] sm:$0xff]  ;;  %v600_v50 = vld [vmem:[%s1426_s6 + $0x178] sm:$0xff] }
 0x110   :  { %528 = vmatpush.msrb.mxu3 %v449_v8  ;;  %470 = vmatpush.msrb.mxu0 %v380_v11  ;;  %v260_v16 = vperm.slane %v1123_v5, 2 }
 0x111   :  { %v844_v14 = vpop.permute.xlu0 %843 }
 0x112   :  { %v321_v15 = vpop.permute.xlu1 %320  ;;  %v845_v23 = vunpack.i.l.bf16 %v844_v14  ;;  %v846_v38 = vunpack.i.h.bf16 %v844_v14  ;;  %v1155_v24 = vpop.permute.xlu2 %169 }
 0x113   :  { %v327_v18 = vsel %vm326_vm9, %v1025_v41, %v321_v15 }
 0x114   :  { %v347_v19 = vmul.f32 %v339_v13, %v327_v18  ;;  %v328_v47 = vsel %vm326_vm9, %v321_v15, %v845_v23  ;;  %v329_v60 = vsel %vm326_vm9, %v845_v23, %v846_v38  ;;  %v335_v40 = vsel %vm326_vm9, %v846_v38, %v1025_v41  ;;  %v1137_v13 = vld [vmem:[%s1423_s5 + $0x1] ss:$8 sm:$0xf] }
 0x115   :  { %v348_v3 = vmul.f32 %v340_v31, %v328_v47  ;;  %v294_v41 = vperm.slane %v1105_v59, 3  ;;  %v349_v30 = vmul.f32 %v341_v35, %v329_v60  ;;  %v350_v7 = vmul.f32 %v342_v46, %v335_v40 }
 0x116   :  { %471 = vmatpush.msrb.mxu0 %v347_v19  ;;  %v866_v18 = vunpack.i.h.bf16 %v1091_v51  ;;  %v865_v19 = vunpack.i.l.bf16 %v1091_v51  ;;  %v227_v23 = vperm.slane %v1137_v13, 2  ;;  %v261_v31 = vperm.slane %v1123_v5, 3  ;;  %v611_v51 = vld [vmem:[%s1426_s6 + $0x1d0] sm:$0xff] }
 0x117   :  { %v228_v35 = vperm.slane %v1137_v13, 3  ;;  %v226_v40 = vperm.slane %v1137_v13, 1 }
 0x118   :  { %472 = vmatpush.msrb.mxu0 %v314_v20  ;;  %v317_v20 = vmul.f32 %v1007_v37, %v309_v0  ;;  %v184_v49 = vsel %vm181_vm13, %v866_v18, %v1155_v24  ;;  %v225_v0 = vperm.slane %v1137_v13, 0  ;;  %v595_v13 = vld [vmem:[%s1426_s6 + $0x150] sm:$0xff] }
 0x119   :  { %v1076_v25 = vpop.permute.xlu0 %848 }
 0x11a   :  { %v834_v32 = vpop.permute.xlu1 %833  ;;  %v851_v52 = vunpack.i.h.bf16 %v1076_v25  ;;  %v850_v55 = vunpack.i.l.bf16 %v1076_v25 }
 0x11b   :  { %v836_v39 = vunpack.i.h.bf16 %v834_v32  ;;  %v835_v42 = vunpack.i.l.bf16 %v834_v32 }
 0x11c   :  { %v281_v8 = vsel %vm279_vm10, %v850_v55, %v851_v52  ;;  %v282_v15 = vsel %vm279_vm10, %v851_v52, %v1068_v17 }
 0x11d   :  { %v394_v45 = vsel %vm392_vm7, %v821_v43, %v835_v42  ;;  %v395_v53 = vsel %vm392_vm7, %v835_v42, %v836_v39  ;;  %v401_v54 = vsel %vm392_vm7, %v836_v39, %v820_v44  ;;  %v451_v43 = vld [vmem:[%s1424_s4] sm:$0xff]  ;;  %v308_v44 = vperm.slane %v1064_v12, 2 }
 0x11e   :  { %v414_v56 = vmul.f32 %v406_v29, %v394_v45  ;;  %v415_v57 = vmul.f32 %v407_v33, %v395_v53  ;;  %v416_v58 = vmul.f32 %v408_v34, %v401_v54  ;;  %454 = vperm.xlu1 %867, %v451_v43   ;;  %v301_v22 = vmul.f32 %v293_v4, %v281_v8  ;;  %v599_v54 = vld [vmem:[%s1426_s6 + $0x170] sm:$0xff]  ;;  %v208_v43 = vpop.permute.xlu2 %207 }
 0x11f   :  { %v316_v14 = vmul.f32 %v1005_v36, %v308_v44  ;;  %v1152_v36 = vld [vmem:[%s1423_s5] ss:$8 sm:$0xf]  ;;  %v302_v26 = vmul.f32 %v294_v41, %v282_v15  ;;  %v183_v29 = vsel %vm181_vm13, %v865_v19, %v866_v18  ;;  %v291_v45 = vperm.slane %v1105_v59, 0 }
 0x120   :  { %489 = vmatpush.msrb.mxu1 %v414_v56  ;;  %509 = vmatpush.msrb.mxu2 %v415_v57  ;;  %v194_v28 = vperm.slane %v1152_v36, 2  ;;  %v195_v47 = vperm.slane %v1152_v36, 3  ;;  %v292_v53 = vperm.slane %v1105_v59, 1  ;;  %v258_v57 = vperm.slane %v1123_v5, 0  ;;  %v616_v44 = vld [vmem:[%s1426_s6 + $0x1f8] sm:$0xff]  ;;  %v598_v59 = vld [vmem:[%s1426_s6 + $0x168] sm:$0xff] }
 0x121   :  { %v1116_v1 = vpop.permute.xlu0 %858  ;;  %529 = vmatpush.msrb.mxu3 %v416_v58  ;;  %v259_v58 = vperm.slane %v1123_v5, 1  ;;  %v615_v4 = vld [vmem:[%s1426_s6 + $0x1f0] sm:$0xff]  ;;  %v612_v15 = vld [vmem:[%s1426_s6 + $0x1d8] sm:$0xff] }
 0x122   :  { %v1125_v6 = vpop.permute.xlu1 %853  ;;  %490 = vmatpush.msrb.mxu1 %v381_v61  ;;  %510 = vmatpush.msrb.mxu2 %v382_v62  ;;  %v861_v9 = vunpack.i.h.bf16 %v1116_v1  ;;  %v860_v10 = vunpack.i.l.bf16 %v1116_v1  ;;  %v202_v42 = vmul.f32 %v194_v28, %v183_v29  ;;  %v203_v56 = vmul.f32 %v195_v47, %v184_v49  ;;  %v597_v1 = vld [vmem:[%s1426_s6 + $0x160] sm:$0xff]  ;;  %v566_v28 = vld [vmem:[%s1426_s6 + $0x68] sm:$0xff]  ;;  %v591_v29 = vld [vmem:[%s1426_s6 + $0x130] sm:$0xff] }
 0x123   :  { %v856_v11 = vunpack.i.h.bf16 %v1125_v6  ;;  %v855_v12 = vunpack.i.l.bf16 %v1125_v6  ;;  %530 = vmatpush.msrb.mxu3 %v383_v2  ;;  %v589_v47 = vld [vmem:[%s1426_s6 + $0x120] sm:$0xff]  ;;  %v579_v49 = vld [vmem:[%s1426_s6 + $0xd0] sm:$0xff] }
 0x124   :  { %491 = vmatpush.msrb.mxu1 %v348_v3  ;;  %511 = vmatpush.msrb.mxu2 %v349_v30  ;;  %v215_v37 = vsel %vm213_vm12, %v860_v10, %v861_v9  ;;  %v214_v2 = vsel %vm213_vm12, %v208_v43, %v860_v10  ;;  %v614_v30 = vld [vmem:[%s1426_s6 + $0x1e8] sm:$0xff]  ;;  %v192_v10 = vperm.slane %v1152_v36, 0 }
 0x125   :  { %531 = vmatpush.msrb.mxu3 %v350_v7  ;;  %v248_v21 = vsel %vm246_vm11, %v855_v12, %v856_v11  ;;  %v235_v34 = vmul.f32 %v227_v23, %v215_v37  ;;  %v596_v7 = vld [vmem:[%s1426_s6 + $0x158] sm:$0xff]  ;;  %v610_v37 = vld [vmem:[%s1426_s6 + $0x1c8] sm:$0xff] }
 0x126   :  { %492 = vmatpush.msrb.mxu1 %v315_v63  ;;  %512 = vmatpush.msrb.mxu2 %v316_v14  ;;  %v268_v27 = vmul.f32 %v260_v16, %v248_v21  ;;  %v594_v16 = vld [vmem:[%s1426_s6 + $0x148] sm:$0xff]  ;;  %v584_v23 = vld [vmem:[%s1426_s6 + $0xf8] sm:$0xff] }
 0x127   :  { %532 = vmatpush.msrb.mxu3 %v317_v20 }
 0x128   :  { %513 = vmatpush.msrb.mxu2 %v301_v22  ;;  %v568_v22 = vld [vmem:[%s1426_s6 + $0x78] sm:$0xff] }
 0x129   :  { %v205_v32 = vpop.permute.xlu0 %204  ;;  %533 = vmatpush.msrb.mxu3 %v302_v26  ;;  %v583_v26 = vld [vmem:[%s1426_s6 + $0xf0] sm:$0xff] }
 0x12a   :  { %v238_v33 = vpop.permute.xlu1 %237  ;;  %514 = vmatpush.msrb.mxu2 %v268_v27  ;;  %v216_v38 = vsel %vm213_vm12, %v861_v9, %v205_v32  ;;  %v221_v41 = vsel %vm213_vm12, %v205_v32, %v208_v43  ;;  %v234_v9 = vmul.f32 %v226_v40, %v214_v2  ;;  %v592_v27 = vld [vmem:[%s1426_s6 + $0x138] sm:$0xff]  ;;  %v609_v32 = vld [vmem:[%s1426_s6 + $0x1c0] sm:$0xff] }
 0x12b   :  { %v249_v39 = vsel %vm246_vm11, %v856_v11, %v238_v33  ;;  %v236_v52 = vmul.f32 %v228_v35, %v216_v38  ;;  %v233_v8 = vmul.f32 %v225_v0, %v221_v41  ;;  %v193_v11 = vperm.slane %v1152_v36, 1  ;;  %v608_v35 = vld [vmem:[%s1426_s6 + $0x1b8] sm:$0xff]  ;;  %v590_v38 = vld [vmem:[%s1426_s6 + $0x128] sm:$0xff]  ;;  %v557_v0 = vld [vmem:[%s1426_s6 + $0x20] sm:$0xff] }
 0x12c   :  { %515 = vmatpush.msrb.mxu2 %v235_v34  ;;  %v269_v46 = vmul.f32 %v261_v31, %v249_v39  ;;  %v582_v31 = vld [vmem:[%s1426_s6 + $0xe8] sm:$0xff]  ;;  %v581_v34 = vld [vmem:[%s1426_s6 + $0xe0] sm:$0xff]  ;;  %v564_v39 = vld [vmem:[%s1426_s6 + $0x58] sm:$0xff] }
 0x12d   :  { %v604_v43 = vld [vmem:[%s1426_s6 + $0x198] sm:$0xff]  ;;  %v573_v2 = vld [vmem:[%s1426_s6 + $0xa0] sm:$0xff] }
 0x12e   :  { %516 = vmatpush.msrb.mxu2 %v202_v42  ;;  %534 = vmatpush.msrb.mxu3 %v269_v46  ;;  %v580_v42 = vld [vmem:[%s1426_s6 + $0xd8] sm:$0xff]  ;;  %v607_v46 = vld [vmem:[%s1426_s6 + $0x1b0] sm:$0xff]  ;;  %v585_v41 = vld [vmem:[%s1426_s6 + $0x100] sm:$0xff] }
 0x12f   :  { %781 = vmatmul.msk.f32.vlgmr.msrb.gmra.mxu2 %vm457_vm14, %v1172_v48  ;;  %v576_v40 = vld [vmem:[%s1426_s6 + $0xb8] sm:$0xff] }
 0x130   :  { %535 = vmatpush.msrb.mxu3 %v236_v52  ;;  %657 = vmatpush.msra.mxu2 %v600_v50  ;;  %v606_v50 = vld [vmem:[%s1426_s6 + $0x1a8] sm:$0xff]  ;;  %v588_v52 = vld [vmem:[%s1426_s6 + $0x118] sm:$0xff] }
 0x131   :  { %v274_v60 = vpop.permute.xlu0 %273 }
 0x132   :  { %v280_v61 = vsel %vm279_vm10, %v274_v60, %v850_v55  ;;  %v287_v62 = vsel %vm279_vm10, %v1068_v17, %v274_v60  ;;  %v241_v63 = vpop.permute.xlu1 %240  ;;  %536 = vmatpush.msrb.mxu3 %v203_v56  ;;  %658 = vmatpush.msra.mxu2 %v599_v54  ;;  %v605_v54 = vld [vmem:[%s1426_s6 + $0x1a0] sm:$0xff]  ;;  %v587_v56 = vld [vmem:[%s1426_s6 + $0x110] sm:$0xff]  ;;  %v560_v60 = vld [vmem:[%s1426_s6 + $0x38] sm:$0xff] }
 0x133   :  { %v247_v3 = vsel %vm246_vm11, %v241_v63, %v855_v12  ;;  %v254_v25 = vsel %vm246_vm11, %v238_v33, %v241_v63  ;;  %782 = vmatmul.msk.f32.vlgmr.msrb.gmra.mxu3 %vm457_vm14, %v1172_v48  ;;  %v299_v55 = vmul.f32 %v291_v45, %v287_v62  ;;  %v300_v17 = vmul.f32 %v292_v53, %v280_v61  ;;  %v613_v12 = vld [vmem:[%s1426_s6 + $0x1e0] sm:$0xff]  ;;  %v562_v45 = vld [vmem:[%s1426_s6 + $0x48] sm:$0xff]  ;;  %v575_v61 = vld [vmem:[%s1426_s6 + $0xb0] sm:$0xff] }
 0x134   :  { %v266_v5 = vmul.f32 %v258_v57, %v254_v25  ;;  %v267_v6 = vmul.f32 %v259_v58, %v247_v3  ;;  %677 = vmatpush.msra.mxu3 %v616_v44  ;;  %659 = vmatpush.msra.mxu2 %v598_v59  ;;  %v565_v33 = vld [vmem:[%s1426_s6 + $0x60] sm:$0xff]  ;;  %v578_v53 = vld [vmem:[%s1426_s6 + $0xc8] sm:$0xff]  ;;  %v603_v44 = vld [vmem:[%s1426_s6 + $0x190] sm:$0xff] }
 0x135   :  { %473 = vmatpush.msrb.mxu0 %v299_v55  ;;  %493 = vmatpush.msrb.mxu1 %v300_v17  ;;  %v561_v57 = vld [vmem:[%s1426_s6 + $0x40] sm:$0xff]  ;;  %v559_v59 = vld [vmem:[%s1426_s6 + $0x30] sm:$0xff]  ;;  %v558_v62 = vld [vmem:[%s1426_s6 + $0x28] sm:$0xff] }
 0x136   :  { %678 = vmatpush.msra.mxu3 %v615_v4  ;;  %660 = vmatpush.msra.mxu2 %v597_v1  ;;  %v577_v58 = vld [vmem:[%s1426_s6 + $0xc0] sm:$0xff]  ;;  %v574_v63 = vld [vmem:[%s1426_s6 + $0xa8] sm:$0xff]  ;;  %v556_v3 = vld [vmem:[%s1426_s6 + $0x18] sm:$0xff] }
 0x137   :  { %474 = vmatpush.msrb.mxu0 %v266_v5  ;;  %494 = vmatpush.msrb.mxu1 %v267_v6  ;;  %v572_v25 = vld [vmem:[%s1426_s6 + $0x98] sm:$0xff]  ;;  %v586_v55 = vld [vmem:[%s1426_s6 + $0x108] sm:$0xff]  ;;  %v555_v4 = vld [vmem:[%s1426_s6 + $0x10] sm:$0xff] }
 0x138   :  { %679 = vmatpush.msra.mxu3 %v614_v30  ;;  %661 = vmatpush.msra.mxu2 %v596_v7  ;;  %v602_v17 = vld [vmem:[%s1426_s6 + $0x188] sm:$0xff]  ;;  %v571_v1 = vld [vmem:[%s1426_s6 + $0x90] sm:$0xff]  ;;  %v601_v5 = vld [vmem:[%s1426_s6 + $0x180] sm:$0xff] }
 0x139   :  { %v176_v14 = vpop.permute.xlu0 %175  ;;  %475 = vmatpush.msrb.mxu0 %v233_v8  ;;  %495 = vmatpush.msrb.mxu1 %v234_v9  ;;  %v554_v6 = vld [vmem:[%s1426_s6 + $0x8] sm:$0xff]  ;;  %v553_v7 = vld [vmem:[%s1426_s6] sm:$0xff] }
 0x13a   :  { %v182_v18 = vsel %vm181_vm13, %v176_v14, %v865_v19  ;;  %v189_v20 = vsel %vm181_vm13, %v1155_v24, %v176_v14  ;;  %680 = vmatpush.msra.mxu3 %v613_v12  ;;  %662 = vmatpush.msra.mxu2 %v595_v13  ;;  %v593_v19 = vld [vmem:[%s1426_s6 + $0x140] sm:$0xff]  ;;  %v567_v24 = vld [vmem:[%s1426_s6 + $0x70] sm:$0xff]  ;;  %v570_v30 = vld [vmem:[%s1426_s6 + $0x88] sm:$0xff]  ;;  %v879_v13 = vmov 1.0  }
 0x13b   :  { %v200_v21 = vmul.f32 %v192_v10, %v189_v20  ;;  %v201_v36 = vmul.f32 %v193_v11, %v182_v18  ;;  %v569_v8 = vld [vmem:[%s1426_s6 + $0x80] sm:$0xff] }
 0x13c   :  { %681 = vmatpush.msra.mxu3 %v612_v15  ;;  %663 = vmatpush.msra.mxu2 %v594_v16 }
 0x13d   :  { %476 = vmatpush.msrb.mxu0 %v200_v21  ;;  %496 = vmatpush.msrb.mxu1 %v201_v36 }
 0x13e   :  { %779 = vmatmul.msk.f32.vlgmr.msrb.gmra.mxu0 %vm457_vm14, %v1172_v48  ;;  %780 = vmatmul.msk.f32.vlgmr.msrb.gmra.mxu1 %vm457_vm14, %v1172_v48  ;;  %v563_v48 = vld [vmem:[%s1426_s6 + $0x50] sm:$0xff]  ;;  %s880_s6 = smov 126  }
 0x13f   :  { %617 = vmatpush.msra.mxu0 %v568_v22  ;;  %637 = vmatpush.msra.mxu1 %v584_v23 }
 0x140   :  { %682 = vmatpush.msra.mxu3 %v611_v51  ;;  %664 = vmatpush.msra.mxu2 %v593_v19 }
 0x141   :  { %618 = vmatpush.msra.mxu0 %v567_v24  ;;  %638 = vmatpush.msra.mxu1 %v583_v26  ;;  %v710_v26 = vld [vmem:[%s1427_s8 + $0x8] sm:$0x3] }
 0x142   :  { %683 = vmatpush.msra.mxu3 %v610_v37  ;;  %665 = vmatpush.msra.mxu2 %v592_v27  ;;  %v709_v37 = vld [vmem:[%s1427_s8] sm:$0xff] }
 0x143   :  { %619 = vmatpush.msra.mxu0 %v566_v28  ;;  %639 = vmatpush.msra.mxu1 %v582_v31 }
 0x144   :  { %684 = vmatpush.msra.mxu3 %v609_v32  ;;  %666 = vmatpush.msra.mxu2 %v591_v29  ;;  %v708_v32 = vld [vmem:[%s1428_s7 + $0x8] sm:$0x3]  ;;  %v707_v29 = vld [vmem:[%s1428_s7] sm:$0xff] }
 0x145   :  { %620 = vmatpush.msra.mxu0 %v565_v33  ;;  %640 = vmatpush.msra.mxu1 %v581_v34 }
 0x146   :  { %685 = vmatpush.msra.mxu3 %v608_v35  ;;  %667 = vmatpush.msra.mxu2 %v590_v38 }
 0x147   :  { %621 = vmatpush.msra.mxu0 %v564_v39  ;;  %641 = vmatpush.msra.mxu1 %v580_v42 }
 0x148   :  { %686 = vmatpush.msra.mxu3 %v607_v46  ;;  %668 = vmatpush.msra.mxu2 %v589_v47 }
 0x149   :  { %622 = vmatpush.msra.mxu0 %v563_v48  ;;  %642 = vmatpush.msra.mxu1 %v579_v49 }
 0x14a   :  { %687 = vmatpush.msra.mxu3 %v606_v50  ;;  %669 = vmatpush.msra.mxu2 %v588_v52 }
 0x14b   :  { %623 = vmatpush.msra.mxu0 %v562_v45  ;;  %643 = vmatpush.msra.mxu1 %v578_v53 }
 0x14c   :  { %688 = vmatpush.msra.mxu3 %v605_v54  ;;  %670 = vmatpush.msra.mxu2 %v587_v56 }
 0x14d   :  { %624 = vmatpush.msra.mxu0 %v561_v57  ;;  %644 = vmatpush.msra.mxu1 %v577_v58 }
 0x14e   :  { %689 = vmatpush.msra.mxu3 %v604_v43  ;;  %671 = vmatpush.msra.mxu2 %v586_v55 }
 0x14f   :  { %625 = vmatpush.msra.mxu0 %v560_v60  ;;  %645 = vmatpush.msra.mxu1 %v576_v40 }
 0x150   :  { %690 = vmatpush.msra.mxu3 %v603_v44  ;;  %672 = vmatpush.msra.mxu2 %v585_v41 }
 0x151   :  { %626 = vmatpush.msra.mxu0 %v559_v59  ;;  %646 = vmatpush.msra.mxu1 %v575_v61 }
 0x152   :  { %691 = vmatpush.msra.mxu3 %v602_v17 }
 0x153   :  { %627 = vmatpush.msra.mxu0 %v558_v62  ;;  %647 = vmatpush.msra.mxu1 %v574_v63 }
 0x154   :  { %692 = vmatpush.msra.mxu3 %v601_v5 }
 0x155   :  { %628 = vmatpush.msra.mxu0 %v557_v0  ;;  %648 = vmatpush.msra.mxu1 %v573_v2 }
 0x157   :  { %629 = vmatpush.msra.mxu0 %v556_v3  ;;  %649 = vmatpush.msra.mxu1 %v572_v25 }
 0x159   :  { %630 = vmatpush.msra.mxu0 %v555_v4  ;;  %650 = vmatpush.msra.mxu1 %v571_v1 }
 0x15b   :  { %631 = vmatpush.msra.mxu0 %v554_v6  ;;  %651 = vmatpush.msra.mxu1 %v570_v30 }
 0x15d   :  { %632 = vmatpush.msra.mxu0 %v553_v7  ;;  %652 = vmatpush.msra.mxu1 %v569_v8 }
 0x190   :  { %v455_v9 = vpop.permute.xlu1 %454 }
 0x1b2   :  { %v518_v10 = vpop.f32.mrf.mxu2 }
 0x1b3   :  { %v519_v11 = vadd.f32 %v518_v10, %v455_v9 }
 0x1b5   :  { %vm543_vm15 = vcmp.ge.f32.partialorder %v519_v11, 1.0 }
 0x1b6   :  { %v538_v12 = vpop.f32.mrf.mxu3  ;;  %789 = vmatmul.msk.f32.vlgmr.msra.gmra.mxu2 %vm543_vm15, %v879_v13 }
 0x1b7   :  { %v539_v14 = vadd.f32 %v538_v12, %v455_v9 }
 0x1b9   :  { %vm544_vm0 = vcmp.ge.f32.partialorder %v539_v14, 1.0 }
 0x1ba   :  { %790 = vmatmul.msk.f32.vlgmr.msra.gmra.mxu3 %vm544_vm0, %v879_v13 }
 0x1bb   :  { %v478_v15 = vpop.f32.mrf.mxu0  ;;  %v498_v16 = vpop.f32.mrf.mxu1 }
 0x1bc   :  { %v479_v18 = vadd.f32 %v478_v15, %v455_v9  ;;  %v499_v20 = vadd.f32 %v498_v16, %v455_v9 }
 0x1be   :  { %vm541_vm1 = vcmp.ge.f32.partialorder %v479_v18, 1.0  ;;  %vm542_vm2 = vcmp.ge.f32.partialorder %v499_v20, 1.0 }
 0x1bf   :  { %787 = vmatmul.msk.f32.vlgmr.msra.gmra.mxu0 %vm541_vm1, %v879_v13  ;;  %788 = vmatmul.msk.f32.vlgmr.msra.gmra.mxu1 %vm542_vm2, %v879_v13 }
 0x239   :  { %v674_v21 = vpop.f32.mrf.mxu2 }
 0x23c   :  { %v634_v36 = vpop.f32.mrf.mxu0  ;;  %v654_v22 = vpop.f32.mrf.mxu1 }
 0x23d   :  { %v655_v23 = vadd.f32 %v654_v22, %v634_v36  ;;  %v694_v19 = vpop.f32.mrf.mxu3 }
 0x23f   :  { %v675_v51 = vadd.f32 %v674_v21, %v655_v23 }
 0x241   :  { %v695_v24 = vadd.f32 %v694_v19, %v675_v51 }
 0x243   :  { %698 = vrot.lane.b32.xlu1 %v695_v24, %s880_s6  ;;  %701 = vrot.lane.b32.xlu0 %v695_v24, %s881_s30 }
 0x244   :  { %704 = vrot.lane.b32.xlu2 %v695_v24, %s882_s10 }
 0x24b   :  { %718 = vperm.xlu0 %811, %v710_v26  }
 0x24c   :  { %713 = vperm.xlu2 %868, %v709_v37  }
 0x29e   :  { %v705_v27 = vpop.permute.xlu2 %704 }
 0x29f   :  { %740 = vmatpush.msrb.mxu0 %v705_v27  ;;  %793 = vmatpush.msrb.mxu1 %v705_v27 }
 0x2a6   :  { %v714_v33 = vpop.permute.xlu2 %713 }
 0x2b5   :  { %v702_v28 = vpop.permute.xlu0 %701  ;;  %v699_v31 = vpop.permute.xlu1 %698 }
 0x2b6   :  { %741 = vmatpush.msrb.mxu0 %v702_v28  ;;  %794 = vmatpush.msrb.mxu1 %v702_v28 }
 0x2b8   :  { %742 = vmatpush.msrb.mxu0 %v699_v31  ;;  %795 = vmatpush.msrb.mxu1 %v699_v31 }
 0x2ba   :  { %743 = vmatpush.msrb.mxu0 %v695_v24  ;;  %796 = vmatpush.msrb.mxu1 %v695_v24 }
 0x2bb   :  { %792 = vmatmul.msk.f32.vlgmr.msrb.gmra.mxu1 %vm721_vm3, %v708_v32  ;;  %791 = vmatmul.msk.f32.vlgmr.msrb.gmra.mxu0 %vm721_vm3, %v707_v29 }
 0x2bd   :  { %v719_v34 = vpop.permute.xlu0 %718 }
 0x338   :  { %v748_v35 = vpop.f32.mrf.mxu1  ;;  %v745_v38 = vpop.f32.mrf.mxu0 }
 0x339   :  { %v749_v39 = vadd.f32 %v748_v35, %v719_v34  ;;  %v746_v42 = vadd.f32 %v745_v38, %v714_v33 }
 0x33b   :  { %754 = vst.msk [vmem:[%s1429_s9 + $0x8] sm:$0x3] %vm753_vm4, %v749_v39 }
 0x33c   :  { %752 = vst.msk [vmem:[%s1429_s9] sm:$0xff] %vm751_vm5, %v746_v42 }

</bundles_post_ra>
